<compile_context>
chip_gen: v6e
topology: v6e:2x2x1
jax: 0.10.0
libtpu: 0.0.40
codegen_flags: <defaults>
</compile_context>

<pallas_src>
import functools

import jax
import jax.numpy as jnp
from jax import lax
from jax.experimental import pallas as pl
from jax.experimental.pallas import tpu as pltpu


def _conv_same_kernel(x_ref, w_ref, o_ref, p_ref, *,
                      n_batch, cin, h, w, kh_sz, kw_sz, pad_flat):
    """Fused zero-pad + im2col + matmul(+bias) for a stride-1 'same' conv.

    x_ref : (N, Cin, HW + 2*pad_flat) f32  per-image flat-padded input (VMEM)
    w_ref : (Cout, K+1)               f32  (kh,kw,ci)-ordered weights, bias last col
    o_ref : (N, Cout, HW)             f32  lane-dense output (reshape -> NCHW)
    p_ref : (K+1, N*HW)               f32  VMEM scratch: im2col patches + ones row
    """
    hw = h * w
    k = cin * kh_sz * kw_sz

    x = x_ref[...]                                        # resident, read once

    # Column-boundary validity mask helper (row boundaries are handled by the
    # 1-D zero halo: out-of-range row taps read zeros from the pad region).
    col = lax.broadcasted_iota(jnp.int32, (n_batch, cin, hw), 2) % w

    # In-kernel im2col: 9 lane-shifted slices -> (K+1, N*HW) patch scratch.
    for kh in range(kh_sz):
        for kw in range(kw_sz):
            t = kh * kw_sz + kw
            dkh = kh - kh_sz // 2
            dkw = kw - kw_sz // 2
            start = pad_flat + dkh * w + dkw              # static Python int
            tap = x[:, :, start:start + hw]               # (N, Cin, HW) lane shift
            if dkw != 0:
                # Lanes whose column index wraps into the neighbouring row
                # must be zero (they correspond to the conv's zero padding).
                valid = jnp.logical_and(col + dkw >= 0, col + dkw < w)
                tap = jnp.where(valid, tap, 0.0)
            for n in range(n_batch):                      # N=2: tiny static unroll
                p_ref[t * cin:(t + 1) * cin, n * hw:(n + 1) * hw] = tap[n]

    # Ones row so the bias column of w_ref is folded into the single matmul.
    p_ref[k:k + 1, :] = jnp.ones((1, n_batch * hw), jnp.float32)

    # One MXU push over the whole batch: (Cout, K+1) @ (K+1, N*HW).
    out = jnp.dot(w_ref[...], p_ref[...], preferred_element_type=jnp.float32)
    for n in range(n_batch):
        o_ref[n] = out[:, n * hw:(n + 1) * hw].astype(o_ref.dtype)  # (Cout, HW)


def my_conv2d_forward(x_nchw, weight_oihw, bias):
    """Equivalent of MyConv2D(nn.Conv2d(Cin, Cout, 3, stride=1, padding=1))(x)."""
    N, Cin, H, W = x_nchw.shape
    Cout, Cin_w, KH, KW = weight_oihw.shape
    assert Cin == Cin_w and KH % 2 == 1 and KW % 2 == 1
    HW = H * W
    K = Cin * KH * KW
    pad_flat = (KH // 2) * W + (KW // 2)                  # 17 for 3x3, W=16

    # Only wrapper-side prep: flatten spatial dims (free reshape) and add a
    # per-image 1-D zero halo.  ~1.13x data, vs the old 9x im2col inflation.
    x_flat = jnp.pad(x_nchw.reshape(N, Cin, HW),
                     ((0, 0), (0, 0), (pad_flat, pad_flat)))      # (N, Cin, HW+2*pad)

    # (kh, kw, ci)-ordered weight matrix (matches patch-row ordering) with the
    # bias appended as one extra column (folded into the matmul).
    w2 = weight_oihw.transpose(0, 2, 3, 1).reshape(Cout, K)
    w2b = jnp.concatenate([w2, bias.reshape(Cout, 1)], axis=1)    # (Cout, K+1)

    kernel = functools.partial(
        _conv_same_kernel, n_batch=N, cin=Cin, h=H, w=W,
        kh_sz=KH, kw_sz=KW, pad_flat=pad_flat)

    # Grid-less call: the whole problem (~100 KiB) lives in VMEM; a 1-step
    # grid would only add per-step bookkeeping and idle double buffers.
    out = pl.pallas_call(
        kernel,
        out_shape=jax.ShapeDtypeStruct((N, Cout, HW), x_nchw.dtype),
        in_specs=[
            pl.BlockSpec(memory_space=pltpu.MemorySpace.VMEM),
            pl.BlockSpec(memory_space=pltpu.MemorySpace.VMEM),
        ],
        out_specs=pl.BlockSpec(memory_space=pltpu.MemorySpace.VMEM),
        scratch_shapes=[pltpu.VMEM((K + 1, N * HW), jnp.float32)],
    )(x_flat, w2b)

    # Pure reshape (no transpose) back to the PyTorch NCHW contract.
    return out.reshape(N, Cout, H, W)


if __name__ == "__main__":
    key = jax.random.PRNGKey(0)
    k_x, k_w, k_b = jax.random.split(key, 3)

    N, Cin, H, W = 2, 4, 16, 16
    Cout, KH, KW = 8, 3, 3

    x = jax.random.normal(k_x, (N, Cin, H, W), dtype=jnp.float32)
    # Deterministic synthetic Conv2d parameters (no checkpoint load).
    weight = jax.random.normal(k_w, (Cout, Cin, KH, KW), dtype=jnp.float32) * 0.1
    bias = jax.random.normal(k_b, (Cout,), dtype=jnp.float32) * 0.1

    out = my_conv2d_forward(x, weight, bias)
    out = jax.block_until_ready(out)

    # Cross-check against XLA's conv (same semantics as nn.Conv2d, padding=1).
    ref = jax.lax.conv_general_dilated(
        x, weight, window_strides=(1, 1), padding=((1, 1), (1, 1)),
        dimension_numbers=("NCHW", "OIHW", "NCHW"),
    ) + bias.reshape(1, Cout, 1, 1)
    assert out.shape == (N, Cout, H, W)
    assert jnp.allclose(out, ref, atol=1e-4, rtol=1e-4)

    print("KERNEL_OK")
</pallas_src>

<mosaic_0001>
module attributes {stable_mosaic.version = 11 : i64} {
  func.func @_conv_same_kernel(%arg0: memref<2x4x290xf32, #tpu.memory_space<vmem>>, %arg1: memref<8x37xf32, #tpu.memory_space<vmem>>, %arg2: memref<2x8x256xf32, #tpu.memory_space<vmem>>, %arg3: memref<37x512xf32, #tpu.memory_space<vmem>>) attributes {dimension_semantics = [], scalar_prefetch = 0 : i64, scratch_operands = 1 : i64, tpu.core_type = #tpu.core_type<tc>} {
    %c0 = arith.constant 0 : index
    %c0_0 = arith.constant 0 : index
    %c0_1 = arith.constant 0 : index
    %0 = vector.load %arg0[%c0, %c0_0, %c0_1] : memref<2x4x290xf32, #tpu.memory_space<vmem>>, vector<2x4x290xf32>
    %1 = tpu.iota {dimensions = array<i32: 2>} : vector<2x4x256xi32>
    %c16_i32 = arith.constant 16 : i32
    %c0_i32 = arith.constant 0 : i32
    %2 = arith.cmpi eq, %c16_i32, %c0_i32 : i32
    %c1_i32 = arith.constant 1 : i32
    %3 = arith.select %2, %c1_i32, %c16_i32 : i32
    %4 = vector.broadcast %3 : i32 to vector<2x4x256xi32>
    %5 = arith.remsi %1, %4 : vector<2x4x256xi32>
    %c0_i32_2 = arith.constant 0 : i32
    %6 = vector.broadcast %c0_i32_2 : i32 to vector<2x4x256xi32>
    %7 = arith.cmpi ne, %5, %6 : vector<2x4x256xi32>
    %c0_i32_3 = arith.constant 0 : i32
    %8 = vector.broadcast %c0_i32_3 : i32 to vector<2x4x256xi32>
    %9 = arith.cmpi slt, %5, %8 : vector<2x4x256xi32>
    %c0_i32_4 = arith.constant 0 : i32
    %10 = arith.cmpi slt, %3, %c0_i32_4 : i32
    %11 = vector.broadcast %10 : i1 to vector<2x4x256xi1>
    %12 = vector.broadcast %11 : vector<2x4x256xi1> to vector<2x4x256xi1>
    %13 = arith.xori %9, %12 : vector<2x4x256xi1>
    %14 = arith.andi %13, %7 : vector<2x4x256xi1>
    %15 = vector.broadcast %3 : i32 to vector<2x4x256xi32>
    %16 = arith.addi %5, %15 : vector<2x4x256xi32>
    %17 = arith.select %14, %16, %5 : vector<2x4x256xi1>, vector<2x4x256xi32>
    %18 = vector.extract_strided_slice %0 {offsets = [0, 0, 0], sizes = [2, 4, 256], strides = [1, 1, 1]} : vector<2x4x290xf32> to vector<2x4x256xf32>
    %c-1_i32 = arith.constant -1 : i32
    %19 = vector.broadcast %c-1_i32 : i32 to vector<2x4x256xi32>
    %20 = arith.addi %17, %19 : vector<2x4x256xi32>
    %c0_i32_5 = arith.constant 0 : i32
    %21 = vector.broadcast %c0_i32_5 : i32 to vector<2x4x256xi32>
    %22 = arith.cmpi sge, %20, %21 : vector<2x4x256xi32>
    %c-1_i32_6 = arith.constant -1 : i32
    %23 = vector.broadcast %c-1_i32_6 : i32 to vector<2x4x256xi32>
    %24 = arith.addi %17, %23 : vector<2x4x256xi32>
    %c16_i32_7 = arith.constant 16 : i32
    %25 = vector.broadcast %c16_i32_7 : i32 to vector<2x4x256xi32>
    %26 = arith.cmpi slt, %24, %25 : vector<2x4x256xi32>
    %27 = arith.andi %22, %26 : vector<2x4x256xi1>
    %cst = arith.constant 0.000000e+00 : f32
    %28 = vector.broadcast %cst : f32 to vector<2x4x256xf32>
    %29 = arith.select %27, %18, %28 : vector<2x4x256xi1>, vector<2x4x256xf32>
    %30 = vector.extract_strided_slice %29 {offsets = [0, 0, 0], sizes = [1, 4, 256], strides = [1, 1, 1]} : vector<2x4x256xf32> to vector<1x4x256xf32>
    %31 = vector.shape_cast %30 : vector<1x4x256xf32> to vector<4x256xf32>
    %c0_8 = arith.constant 0 : index
    %c0_9 = arith.constant 0 : index
    %32 = vector.load %arg3[%c0_8, %c0_9] : memref<37x512xf32, #tpu.memory_space<vmem>>, vector<4x256xf32>
    tpu.vector_store %arg3[%c0_8, %c0_9], %31 {strides = array<i32>} : memref<37x512xf32, #tpu.memory_space<vmem>>, vector<4x256xf32>,
    %33 = vector.extract_strided_slice %29 {offsets = [1, 0, 0], sizes = [1, 4, 256], strides = [1, 1, 1]} : vector<2x4x256xf32> to vector<1x4x256xf32>
    %34 = vector.shape_cast %33 : vector<1x4x256xf32> to vector<4x256xf32>
    %c0_10 = arith.constant 0 : index
    %c256 = arith.constant 256 : index
    %35 = vector.load %arg3[%c0_10, %c256] : memref<37x512xf32, #tpu.memory_space<vmem>>, vector<4x256xf32>
    tpu.vector_store %arg3[%c0_10, %c256], %34 {strides = array<i32>} : memref<37x512xf32, #tpu.memory_space<vmem>>, vector<4x256xf32>,
    %36 = vector.extract_strided_slice %0 {offsets = [0, 0, 1], sizes = [2, 4, 256], strides = [1, 1, 1]} : vector<2x4x290xf32> to vector<2x4x256xf32>
    %37 = vector.extract_strided_slice %36 {offsets = [0, 0, 0], sizes = [1, 4, 256], strides = [1, 1, 1]} : vector<2x4x256xf32> to vector<1x4x256xf32>
    %38 = vector.shape_cast %37 : vector<1x4x256xf32> to vector<4x256xf32>
    %c4 = arith.constant 4 : index
    %c0_11 = arith.constant 0 : index
    %39 = vector.load %arg3[%c4, %c0_11] : memref<37x512xf32, #tpu.memory_space<vmem>>, vector<4x256xf32>
    tpu.vector_store %arg3[%c4, %c0_11], %38 {strides = array<i32>} : memref<37x512xf32, #tpu.memory_space<vmem>>, vector<4x256xf32>,
    %40 = vector.extract_strided_slice %36 {offsets = [1, 0, 0], sizes = [1, 4, 256], strides = [1, 1, 1]} : vector<2x4x256xf32> to vector<1x4x256xf32>
    %41 = vector.shape_cast %40 : vector<1x4x256xf32> to vector<4x256xf32>
    %c4_12 = arith.constant 4 : index
    %c256_13 = arith.constant 256 : index
    %42 = vector.load %arg3[%c4_12, %c256_13] : memref<37x512xf32, #tpu.memory_space<vmem>>, vector<4x256xf32>
    tpu.vector_store %arg3[%c4_12, %c256_13], %41 {strides = array<i32>} : memref<37x512xf32, #tpu.memory_space<vmem>>, vector<4x256xf32>,
    %43 = vector.extract_strided_slice %0 {offsets = [0, 0, 2], sizes = [2, 4, 256], strides = [1, 1, 1]} : vector<2x4x290xf32> to vector<2x4x256xf32>
    %c1_i32_14 = arith.constant 1 : i32
    %44 = vector.broadcast %c1_i32_14 : i32 to vector<2x4x256xi32>
    %45 = arith.addi %17, %44 : vector<2x4x256xi32>
    %c0_i32_15 = arith.constant 0 : i32
    %46 = vector.broadcast %c0_i32_15 : i32 to vector<2x4x256xi32>
    %47 = arith.cmpi sge, %45, %46 : vector<2x4x256xi32>
    %c1_i32_16 = arith.constant 1 : i32
    %48 = vector.broadcast %c1_i32_16 : i32 to vector<2x4x256xi32>
    %49 = arith.addi %17, %48 : vector<2x4x256xi32>
    %c16_i32_17 = arith.constant 16 : i32
    %50 = vector.broadcast %c16_i32_17 : i32 to vector<2x4x256xi32>
    %51 = arith.cmpi slt, %49, %50 : vector<2x4x256xi32>
    %52 = arith.andi %47, %51 : vector<2x4x256xi1>
    %cst_18 = arith.constant 0.000000e+00 : f32
    %53 = vector.broadcast %cst_18 : f32 to vector<2x4x256xf32>
    %54 = arith.select %52, %43, %53 : vector<2x4x256xi1>, vector<2x4x256xf32>
    %55 = vector.extract_strided_slice %54 {offsets = [0, 0, 0], sizes = [1, 4, 256], strides = [1, 1, 1]} : vector<2x4x256xf32> to vector<1x4x256xf32>
    %56 = vector.shape_cast %55 : vector<1x4x256xf32> to vector<4x256xf32>
    %c8 = arith.constant 8 : index
    %c0_19 = arith.constant 0 : index
    %57 = vector.load %arg3[%c8, %c0_19] : memref<37x512xf32, #tpu.memory_space<vmem>>, vector<4x256xf32>
    tpu.vector_store %arg3[%c8, %c0_19], %56 {strides = array<i32>} : memref<37x512xf32, #tpu.memory_space<vmem>>, vector<4x256xf32>,
    %58 = vector.extract_strided_slice %54 {offsets = [1, 0, 0], sizes = [1, 4, 256], strides = [1, 1, 1]} : vector<2x4x256xf32> to vector<1x4x256xf32>
    %59 = vector.shape_cast %58 : vector<1x4x256xf32> to vector<4x256xf32>
    %c8_20 = arith.constant 8 : index
    %c256_21 = arith.constant 256 : index
    %60 = vector.load %arg3[%c8_20, %c256_21] : memref<37x512xf32, #tpu.memory_space<vmem>>, vector<4x256xf32>
    tpu.vector_store %arg3[%c8_20, %c256_21], %59 {strides = array<i32>} : memref<37x512xf32, #tpu.memory_space<vmem>>, vector<4x256xf32>,
    %61 = vector.extract_strided_slice %0 {offsets = [0, 0, 16], sizes = [2, 4, 256], strides = [1, 1, 1]} : vector<2x4x290xf32> to vector<2x4x256xf32>
    %c-1_i32_22 = arith.constant -1 : i32
    %62 = vector.broadcast %c-1_i32_22 : i32 to vector<2x4x256xi32>
    %63 = arith.addi %17, %62 : vector<2x4x256xi32>
    %c0_i32_23 = arith.constant 0 : i32
    %64 = vector.broadcast %c0_i32_23 : i32 to vector<2x4x256xi32>
    %65 = arith.cmpi sge, %63, %64 : vector<2x4x256xi32>
    %c-1_i32_24 = arith.constant -1 : i32
    %66 = vector.broadcast %c-1_i32_24 : i32 to vector<2x4x256xi32>
    %67 = arith.addi %17, %66 : vector<2x4x256xi32>
    %c16_i32_25 = arith.constant 16 : i32
    %68 = vector.broadcast %c16_i32_25 : i32 to vector<2x4x256xi32>
    %69 = arith.cmpi slt, %67, %68 : vector<2x4x256xi32>
    %70 = arith.andi %65, %69 : vector<2x4x256xi1>
    %cst_26 = arith.constant 0.000000e+00 : f32
    %71 = vector.broadcast %cst_26 : f32 to vector<2x4x256xf32>
    %72 = arith.select %70, %61, %71 : vector<2x4x256xi1>, vector<2x4x256xf32>
    %73 = vector.extract_strided_slice %72 {offsets = [0, 0, 0], sizes = [1, 4, 256], strides = [1, 1, 1]} : vector<2x4x256xf32> to vector<1x4x256xf32>
    %74 = vector.shape_cast %73 : vector<1x4x256xf32> to vector<4x256xf32>
    %c12 = arith.constant 12 : index
    %c0_27 = arith.constant 0 : index
    %75 = vector.load %arg3[%c12, %c0_27] : memref<37x512xf32, #tpu.memory_space<vmem>>, vector<4x256xf32>
    tpu.vector_store %arg3[%c12, %c0_27], %74 {strides = array<i32>} : memref<37x512xf32, #tpu.memory_space<vmem>>, vector<4x256xf32>,
    %76 = vector.extract_strided_slice %72 {offsets = [1, 0, 0], sizes = [1, 4, 256], strides = [1, 1, 1]} : vector<2x4x256xf32> to vector<1x4x256xf32>
    %77 = vector.shape_cast %76 : vector<1x4x256xf32> to vector<4x256xf32>
    %c12_28 = arith.constant 12 : index
    %c256_29 = arith.constant 256 : index
    %78 = vector.load %arg3[%c12_28, %c256_29] : memref<37x512xf32, #tpu.memory_space<vmem>>, vector<4x256xf32>
    tpu.vector_store %arg3[%c12_28, %c256_29], %77 {strides = array<i32>} : memref<37x512xf32, #tpu.memory_space<vmem>>, vector<4x256xf32>,
    %79 = vector.extract_strided_slice %0 {offsets = [0, 0, 17], sizes = [2, 4, 256], strides = [1, 1, 1]} : vector<2x4x290xf32> to vector<2x4x256xf32>
    %80 = vector.extract_strided_slice %79 {offsets = [0, 0, 0], sizes = [1, 4, 256], strides = [1, 1, 1]} : vector<2x4x256xf32> to vector<1x4x256xf32>
    %81 = vector.shape_cast %80 : vector<1x4x256xf32> to vector<4x256xf32>
    %c16 = arith.constant 16 : index
    %c0_30 = arith.constant 0 : index
    %82 = vector.load %arg3[%c16, %c0_30] : memref<37x512xf32, #tpu.memory_space<vmem>>, vector<4x256xf32>
    tpu.vector_store %arg3[%c16, %c0_30], %81 {strides = array<i32>} : memref<37x512xf32, #tpu.memory_space<vmem>>, vector<4x256xf32>,
    %83 = vector.extract_strided_slice %79 {offsets = [1, 0, 0], sizes = [1, 4, 256], strides = [1, 1, 1]} : vector<2x4x256xf32> to vector<1x4x256xf32>
    %84 = vector.shape_cast %83 : vector<1x4x256xf32> to vector<4x256xf32>
    %c16_31 = arith.constant 16 : index
    %c256_32 = arith.constant 256 : index
    %85 = vector.load %arg3[%c16_31, %c256_32] : memref<37x512xf32, #tpu.memory_space<vmem>>, vector<4x256xf32>
    tpu.vector_store %arg3[%c16_31, %c256_32], %84 {strides = array<i32>} : memref<37x512xf32, #tpu.memory_space<vmem>>, vector<4x256xf32>,
    %86 = vector.extract_strided_slice %0 {offsets = [0, 0, 18], sizes = [2, 4, 256], strides = [1, 1, 1]} : vector<2x4x290xf32> to vector<2x4x256xf32>
    %c1_i32_33 = arith.constant 1 : i32
    %87 = vector.broadcast %c1_i32_33 : i32 to vector<2x4x256xi32>
    %88 = arith.addi %17, %87 : vector<2x4x256xi32>
    %c0_i32_34 = arith.constant 0 : i32
    %89 = vector.broadcast %c0_i32_34 : i32 to vector<2x4x256xi32>
    %90 = arith.cmpi sge, %88, %89 : vector<2x4x256xi32>
    %c1_i32_35 = arith.constant 1 : i32
    %91 = vector.broadcast %c1_i32_35 : i32 to vector<2x4x256xi32>
    %92 = arith.addi %17, %91 : vector<2x4x256xi32>
    %c16_i32_36 = arith.constant 16 : i32
    %93 = vector.broadcast %c16_i32_36 : i32 to vector<2x4x256xi32>
    %94 = arith.cmpi slt, %92, %93 : vector<2x4x256xi32>
    %95 = arith.andi %90, %94 : vector<2x4x256xi1>
    %cst_37 = arith.constant 0.000000e+00 : f32
    %96 = vector.broadcast %cst_37 : f32 to vector<2x4x256xf32>
    %97 = arith.select %95, %86, %96 : vector<2x4x256xi1>, vector<2x4x256xf32>
    %98 = vector.extract_strided_slice %97 {offsets = [0, 0, 0], sizes = [1, 4, 256], strides = [1, 1, 1]} : vector<2x4x256xf32> to vector<1x4x256xf32>
    %99 = vector.shape_cast %98 : vector<1x4x256xf32> to vector<4x256xf32>
    %c20 = arith.constant 20 : index
    %c0_38 = arith.constant 0 : index
    %100 = vector.load %arg3[%c20, %c0_38] : memref<37x512xf32, #tpu.memory_space<vmem>>, vector<4x256xf32>
    tpu.vector_store %arg3[%c20, %c0_38], %99 {strides = array<i32>} : memref<37x512xf32, #tpu.memory_space<vmem>>, vector<4x256xf32>,
    %101 = vector.extract_strided_slice %97 {offsets = [1, 0, 0], sizes = [1, 4, 256], strides = [1, 1, 1]} : vector<2x4x256xf32> to vector<1x4x256xf32>
    %102 = vector.shape_cast %101 : vector<1x4x256xf32> to vector<4x256xf32>
    %c20_39 = arith.constant 20 : index
    %c256_40 = arith.constant 256 : index
    %103 = vector.load %arg3[%c20_39, %c256_40] : memref<37x512xf32, #tpu.memory_space<vmem>>, vector<4x256xf32>
    tpu.vector_store %arg3[%c20_39, %c256_40], %102 {strides = array<i32>} : memref<37x512xf32, #tpu.memory_space<vmem>>, vector<4x256xf32>,
    %104 = vector.extract_strided_slice %0 {offsets = [0, 0, 32], sizes = [2, 4, 256], strides = [1, 1, 1]} : vector<2x4x290xf32> to vector<2x4x256xf32>
    %c-1_i32_41 = arith.constant -1 : i32
    %105 = vector.broadcast %c-1_i32_41 : i32 to vector<2x4x256xi32>
    %106 = arith.addi %17, %105 : vector<2x4x256xi32>
    %c0_i32_42 = arith.constant 0 : i32
    %107 = vector.broadcast %c0_i32_42 : i32 to vector<2x4x256xi32>
    %108 = arith.cmpi sge, %106, %107 : vector<2x4x256xi32>
    %c-1_i32_43 = arith.constant -1 : i32
    %109 = vector.broadcast %c-1_i32_43 : i32 to vector<2x4x256xi32>
    %110 = arith.addi %17, %109 : vector<2x4x256xi32>
    %c16_i32_44 = arith.constant 16 : i32
    %111 = vector.broadcast %c16_i32_44 : i32 to vector<2x4x256xi32>
    %112 = arith.cmpi slt, %110, %111 : vector<2x4x256xi32>
    %113 = arith.andi %108, %112 : vector<2x4x256xi1>
    %cst_45 = arith.constant 0.000000e+00 : f32
    %114 = vector.broadcast %cst_45 : f32 to vector<2x4x256xf32>
    %115 = arith.select %113, %104, %114 : vector<2x4x256xi1>, vector<2x4x256xf32>
    %116 = vector.extract_strided_slice %115 {offsets = [0, 0, 0], sizes = [1, 4, 256], strides = [1, 1, 1]} : vector<2x4x256xf32> to vector<1x4x256xf32>
    %117 = vector.shape_cast %116 : vector<1x4x256xf32> to vector<4x256xf32>
    %c24 = arith.constant 24 : index
    %c0_46 = arith.constant 0 : index
    %118 = vector.load %arg3[%c24, %c0_46] : memref<37x512xf32, #tpu.memory_space<vmem>>, vector<4x256xf32>
    tpu.vector_store %arg3[%c24, %c0_46], %117 {strides = array<i32>} : memref<37x512xf32, #tpu.memory_space<vmem>>, vector<4x256xf32>,
    %119 = vector.extract_strided_slice %115 {offsets = [1, 0, 0], sizes = [1, 4, 256], strides = [1, 1, 1]} : vector<2x4x256xf32> to vector<1x4x256xf32>
    %120 = vector.shape_cast %119 : vector<1x4x256xf32> to vector<4x256xf32>
    %c24_47 = arith.constant 24 : index
    %c256_48 = arith.constant 256 : index
    %121 = vector.load %arg3[%c24_47, %c256_48] : memref<37x512xf32, #tpu.memory_space<vmem>>, vector<4x256xf32>
    tpu.vector_store %arg3[%c24_47, %c256_48], %120 {strides = array<i32>} : memref<37x512xf32, #tpu.memory_space<vmem>>, vector<4x256xf32>,
    %122 = vector.extract_strided_slice %0 {offsets = [0, 0, 33], sizes = [2, 4, 256], strides = [1, 1, 1]} : vector<2x4x290xf32> to vector<2x4x256xf32>
    %123 = vector.extract_strided_slice %122 {offsets = [0, 0, 0], sizes = [1, 4, 256], strides = [1, 1, 1]} : vector<2x4x256xf32> to vector<1x4x256xf32>
    %124 = vector.shape_cast %123 : vector<1x4x256xf32> to vector<4x256xf32>
    %c28 = arith.constant 28 : index
    %c0_49 = arith.constant 0 : index
    %125 = vector.load %arg3[%c28, %c0_49] : memref<37x512xf32, #tpu.memory_space<vmem>>, vector<4x256xf32>
    tpu.vector_store %arg3[%c28, %c0_49], %124 {strides = array<i32>} : memref<37x512xf32, #tpu.memory_space<vmem>>, vector<4x256xf32>,
    %126 = vector.extract_strided_slice %122 {offsets = [1, 0, 0], sizes = [1, 4, 256], strides = [1, 1, 1]} : vector<2x4x256xf32> to vector<1x4x256xf32>
    %127 = vector.shape_cast %126 : vector<1x4x256xf32> to vector<4x256xf32>
    %c28_50 = arith.constant 28 : index
    %c256_51 = arith.constant 256 : index
    %128 = vector.load %arg3[%c28_50, %c256_51] : memref<37x512xf32, #tpu.memory_space<vmem>>, vector<4x256xf32>
    tpu.vector_store %arg3[%c28_50, %c256_51], %127 {strides = array<i32>} : memref<37x512xf32, #tpu.memory_space<vmem>>, vector<4x256xf32>,
    %129 = vector.extract_strided_slice %0 {offsets = [0, 0, 34], sizes = [2, 4, 256], strides = [1, 1, 1]} : vector<2x4x290xf32> to vector<2x4x256xf32>
    %c1_i32_52 = arith.constant 1 : i32
    %130 = vector.broadcast %c1_i32_52 : i32 to vector<2x4x256xi32>
    %131 = arith.addi %17, %130 : vector<2x4x256xi32>
    %c0_i32_53 = arith.constant 0 : i32
    %132 = vector.broadcast %c0_i32_53 : i32 to vector<2x4x256xi32>
    %133 = arith.cmpi sge, %131, %132 : vector<2x4x256xi32>
    %c1_i32_54 = arith.constant 1 : i32
    %134 = vector.broadcast %c1_i32_54 : i32 to vector<2x4x256xi32>
    %135 = arith.addi %17, %134 : vector<2x4x256xi32>
    %c16_i32_55 = arith.constant 16 : i32
    %136 = vector.broadcast %c16_i32_55 : i32 to vector<2x4x256xi32>
    %137 = arith.cmpi slt, %135, %136 : vector<2x4x256xi32>
    %138 = arith.andi %133, %137 : vector<2x4x256xi1>
    %cst_56 = arith.constant 0.000000e+00 : f32
    %139 = vector.broadcast %cst_56 : f32 to vector<2x4x256xf32>
    %140 = arith.select %138, %129, %139 : vector<2x4x256xi1>, vector<2x4x256xf32>
    %141 = vector.extract_strided_slice %140 {offsets = [0, 0, 0], sizes = [1, 4, 256], strides = [1, 1, 1]} : vector<2x4x256xf32> to vector<1x4x256xf32>
    %142 = vector.shape_cast %141 : vector<1x4x256xf32> to vector<4x256xf32>
    %c32 = arith.constant 32 : index
    %c0_57 = arith.constant 0 : index
    %143 = vector.load %arg3[%c32, %c0_57] : memref<37x512xf32, #tpu.memory_space<vmem>>, vector<4x256xf32>
    tpu.vector_store %arg3[%c32, %c0_57], %142 {strides = array<i32>} : memref<37x512xf32, #tpu.memory_space<vmem>>, vector<4x256xf32>,
    %144 = vector.extract_strided_slice %140 {offsets = [1, 0, 0], sizes = [1, 4, 256], strides = [1, 1, 1]} : vector<2x4x256xf32> to vector<1x4x256xf32>
    %145 = vector.shape_cast %144 : vector<1x4x256xf32> to vector<4x256xf32>
    %c32_58 = arith.constant 32 : index
    %c256_59 = arith.constant 256 : index
    %146 = vector.load %arg3[%c32_58, %c256_59] : memref<37x512xf32, #tpu.memory_space<vmem>>, vector<4x256xf32>
    tpu.vector_store %arg3[%c32_58, %c256_59], %145 {strides = array<i32>} : memref<37x512xf32, #tpu.memory_space<vmem>>, vector<4x256xf32>,
    %cst_60 = arith.constant 1.000000e+00 : f32
    %147 = vector.broadcast %cst_60 : f32 to vector<1x512xf32>
    %c36 = arith.constant 36 : index
    %c0_61 = arith.constant 0 : index
    %148 = vector.load %arg3[%c36, %c0_61] : memref<37x512xf32, #tpu.memory_space<vmem>>, vector<1x512xf32>
    tpu.vector_store %arg3[%c36, %c0_61], %147 {strides = array<i32>} : memref<37x512xf32, #tpu.memory_space<vmem>>, vector<1x512xf32>,
    %c0_62 = arith.constant 0 : index
    %c0_63 = arith.constant 0 : index
    %149 = vector.load %arg1[%c0_62, %c0_63] : memref<8x37xf32, #tpu.memory_space<vmem>>, vector<8x37xf32>
    %c0_64 = arith.constant 0 : index
    %c0_65 = arith.constant 0 : index
    %150 = vector.load %arg3[%c0_64, %c0_65] : memref<37x512xf32, #tpu.memory_space<vmem>>, vector<37x512xf32>
    %cst_66 = arith.constant dense<0.000000e+00> : vector<8x512xf32>
    %151 = tpu.matmul %149, %150, %cst_66 {dimension_numbers = #tpu.dot_dimension_numbers<[1], [0], [0], [1], [0, 0, 1, 1], [], []>} : vector<8x37xf32>, vector<37x512xf32>, vector<8x512xf32> -> vector<8x512xf32>
    %152 = vector.extract_strided_slice %151 {offsets = [0, 0], sizes = [8, 256], strides = [1, 1]} : vector<8x512xf32> to vector<8x256xf32>
    %c0_67 = arith.constant 0 : index
    %c0_68 = arith.constant 0 : index
    %c0_69 = arith.constant 0 : index
    %153 = vector.load %arg2[%c0_67, %c0_68, %c0_69] : memref<2x8x256xf32, #tpu.memory_space<vmem>>, vector<1x8x256xf32>
    %154 = vector.shape_cast %153 : vector<1x8x256xf32> to vector<8x256xf32>
    %155 = vector.shape_cast %152 : vector<8x256xf32> to vector<1x8x256xf32>
    tpu.vector_store %arg2[%c0_67, %c0_68, %c0_69], %155 {strides = array<i32>} : memref<2x8x256xf32, #tpu.memory_space<vmem>>, vector<1x8x256xf32>,
    %156 = vector.extract_strided_slice %151 {offsets = [0, 256], sizes = [8, 256], strides = [1, 1]} : vector<8x512xf32> to vector<8x256xf32>
    %c1 = arith.constant 1 : index
    %c0_70 = arith.constant 0 : index
    %c0_71 = arith.constant 0 : index
    %157 = vector.load %arg2[%c1, %c0_70, %c0_71] : memref<2x8x256xf32, #tpu.memory_space<vmem>>, vector<1x8x256xf32>
    %158 = vector.shape_cast %157 : vector<1x8x256xf32> to vector<8x256xf32>
    %159 = vector.shape_cast %156 : vector<8x256xf32> to vector<1x8x256xf32>
    tpu.vector_store %arg2[%c1, %c0_70, %c0_71], %159 {strides = array<i32>} : memref<2x8x256xf32, #tpu.memory_space<vmem>>, vector<1x8x256xf32>,
    return
  }
}

</mosaic_0001>

<bundles_post_ra>
// kernel: tpu_custom_call.1
= control target key start
LH: loop header
LB: loop body
LE: loop exit
PB: predicated region body
PF: predicated region fallthrough
CT: control target
= control target key end

     0   :  { %7 = vsyncpa [#allocation4], 0  ;;  %s844_s0 = inlined_call_operand.hbm [shape: f32[2,4,290], index: 0, kind: input, shape index: {}]   ;;  %s845_s1 = inlined_call_operand.hbm [shape: f32[8,37], index: 1, kind: input, shape index: {}]   ;;  %s846_s2 = inlined_call_operand.hbm [shape: f32[2,8,256], index: 2, kind: output, shape index: {}]  }
   0x1   :  { %8 = vsyncpa [#allocation7], 0 }
   0x2   :  { %9 = vsyncpa [#allocation5], 0  ;;  %s654_s9 = smov [#allocation3]  }
   0x3   :  { %s15_s10 = sshll.u32 %s654_s9, 4  ;;  %s16_s10 = int_to_ptr.vmem [resolvable:$true] %s15_s10 }
   0x4   :  { %s596_s11 = scalar_lea.vmem %s16_s10, 384  ;;  %p601_p1 = scmp.lt.s32.totalorder %s16_s10, %s16_s10 }
   0x5   :  { %p597_p0 = scmp.ne.s32.totalorder %s16_s10, %s596_s11  ;;  %p602_p2 = scmp.lt.s32.totalorder %s596_s11, %s596_s11 }
   0x7   :  { %p603_p3 = por %p602_p2, %p601_p1 }
   0x9   :  { %p604_p4 = pnand %p603_p3, %p597_p0 }
   0xb   :  { %607 = shalt.err (!%p604_p4)
}
   0xc   :  { %s655_s12 = smov 192   ;;  %s656_s13 = smov 12  }
   0xd   :  { %21 = dma.hbm_to_vmem [thread:$0]  %s844_s0, 384, %s16_s10, [#allocation4], %s655_s12, %s655_s12, %s656_s13  }
   0xe   :  { %s657_s16 = smov [#allocation6]  }
   0xf   :  { %s28_s17 = sshll.u32 %s657_s16, 4  ;;  %s29_s17 = int_to_ptr.vmem [resolvable:$true] %s28_s17 }
  0x10   :  { %s616_s18 = scalar_lea.vmem %s29_s17, 128  ;;  %p621_p6 = scmp.lt.s32.totalorder %s29_s17, %s29_s17 }
  0x11   :  { %p617_p5 = scmp.ne.s32.totalorder %s29_s17, %s616_s18  ;;  %p622_p7 = scmp.lt.s32.totalorder %s616_s18, %s616_s18 }
  0x13   :  { %p623_p8 = por %p622_p7, %p621_p6 }
  0x15   :  { %p624_p9 = pnand %p623_p8, %p617_p5 }
  0x17   :  { %627 = shalt.err (!%p624_p9)
}
  0x18   :  { %31 = dma.hbm_to_vmem [thread:$0]  %s845_s1, 128, %s29_s17, [#allocation7]  }
  0x19   :  { %648 = dma.done.wait [#allocation4], 384  }
  0x1a   :  { %649 = vsyncadd [#allocation4], 4294966912 }
  0x1b   :  { %650 = dma.done.wait [#allocation7], 128  }
  0x1c   :  { %651 = vsyncadd [#allocation7], 4294967168  ;;  %v42_v0 = vlaneseq  ;;  %v658_v1 = vmov 1.0   ;;  %v694_v3 = vld [vmem:[#allocation3 + $0x14] sm:$0xf]  ;;  %s659_s0 = smov 94  }
  0x1d   :  { %v696_v4 = vld [vmem:[#allocation3 + $0x8] sm:$0xf]  ;;  %330 = vrot.lane.b32.xlu1 %v694_v3, %s659_s0  ;;  %v703_v6 = vld [vmem:[#allocation3 + $0xc] sm:$0xff]  ;;  %v705_v7 = vld [vmem:[#allocation3] sm:$0xff]  ;;  %s660_s1 = smov 110   ;;  %s661_s21 = smov 96   ;;  %v109_v19 = vcombine.low %v694_v3, %v694_v3 }
  0x1e   :  { %vm351_vm0 = vcmp.lt.s32.totalorder %v42_v0, 512  ;;  %v692_v2 = vand.u32 127, %v42_v0  ;;  %324 = vrot.lane.b32.xlu0 %v696_v4, %s659_s0  ;;  %v80_v8 = vcombine.high %v703_v6, %v703_v6  ;;  %v79_v9 = vcombine.high %v705_v7, %v705_v7  ;;  %s662_s22 = smov 95   ;;  %s663_s23 = smov 112  }
  0x1f   :  { %354 = vst.msk [vmem:[#allocation2 + $0x84] ss:$8 sm:$0xf] %vm351_vm0, %v658_v1  ;;  %v93_v18 = vcombine.low %v696_v4, %v696_v4  ;;  %v108_v20 = vcombine.low %v703_v6, %v703_v6  ;;  %v92_v21 = vcombine.low %v705_v7, %v705_v7  ;;  %s664_s24 = smov 111   ;;  %s665_s25 = smov 126   ;;  %v667_v22 = vmov 0.0  }
  0x20   :  { %v701_v5 = vadd.s32 128, %v692_v2  ;;  %v49_v14 = vand.u32 15, %v692_v2  ;;  %s666_s26 = smov 127   ;;  %458 = vmatprep.mubr.f32.mxu0 %v667_v22  ;;  %529 = vmatprep.mubr.f32.mxu1 %v667_v22  ;;  %vm332_vm3 = vcmask 769024   ;;  %vm237_vm6 = vcmask 900096   ;;  %s668_s27 = smov [#allocation8]  }
  0x21   :  { %326 = vrot.lane.b32.xlu1 %v703_v6, %s659_s0  ;;  %vm381_vm7 = vcmask 1044480   ;;  %vm278_vm8 = vcmask 785408   ;;  %vm301_vm9 = vcmask 777216   ;;  %vm171_vm10 = vcmask 916480   ;;  %s546_s28 = sshll.u32 %s668_s27, 4  ;;  %s547_s28 = int_to_ptr.vmem [resolvable:$true] %s546_s28 }
  0x22   :  { %320 = vrot.lane.b32.xlu0 %v705_v7, %s659_s0  ;;  %v56_v10 = vand.u32 15, %v701_v5  ;;  %v726_v15 = vadd.s32 4294967295, %v49_v14  ;;  %v765_v25 = vadd.s32 1, %v49_v14  ;;  %vm206_vm11 = vcmask 908288   ;;  %s628_s29 = scalar_lea.vmem %s547_s28, 512  ;;  %p633_p11 = scmp.lt.s32.totalorder %s547_s28, %s547_s28 }
  0x23   :  { %vm142_vm12 = vcmask 1031168   ;;  %vm100_vm13 = vcmask 1039360   ;;  %vm377_vm14 = vcmask 302080   ;;  %p629_p10 = scmp.ne.s32.totalorder %s547_s28, %s628_s29  ;;  %p634_p12 = scmp.lt.s32.totalorder %s628_s29, %s628_s29 }
  0x24   :  { %v716_v11 = vadd.s32 4294967295, %v56_v10  ;;  %vm71_vm2 = vcmp.ge.s32.totalorder %v726_v15, 0  ;;  %v769_v26 = vadd.s32 1, %v56_v10  ;;  %vm126_vm4 = vcmp.lt.s32.totalorder %v765_v25, 16 }
  0x25   :  { %328 = vrot.lane.b32.xlu1 %v80_v8, %s659_s0  ;;  %v85_v16 = vsel %vm71_vm2, %v703_v6, 0.0  ;;  %v83_v17 = vsel %vm71_vm2, %v705_v7, 0.0  ;;  %p635_p13 = por %p634_p12, %p633_p11 }
  0x26   :  { %322 = vrot.lane.b32.xlu0 %v79_v9, %s659_s0  ;;  %vm72_vm1 = vcmp.ge.s32.totalorder %v716_v11, 0  ;;  %89 = vst [vmem:[#allocation2 + $0x10] sm:$0xf] %v85_v16  ;;  %87 = vst [vmem:[#allocation2] sm:$0xf] %v83_v17  ;;  %vm127_vm5 = vcmp.lt.s32.totalorder %v769_v26, 16 }
  0x27   :  { %v86_v12 = vsel %vm72_vm1, %v80_v8, 0.0  ;;  %v84_v13 = vsel %vm72_vm1, %v79_v9, 0.0  ;;  %p636_p0 = pnand %p635_p13, %p629_p10 }
  0x28   :  { %90 = vst [vmem:[#allocation2 + $0x18] sm:$0xf] %v86_v12  ;;  %88 = vst [vmem:[#allocation2 + $0x8] sm:$0xf] %v84_v13 }
  0x29   :  { %229 = vrot.lane.b32.xlu1 %v696_v4, %s660_s1 }
  0x2a   :  { %227 = vrot.lane.b32.xlu0 %v79_v9, %s660_s1 }
  0x2d   :  { %235 = vrot.lane.b32.xlu1 %v694_v3, %s660_s1 }
  0x2e   :  { %233 = vrot.lane.b32.xlu0 %v80_v8, %s660_s1 }
  0x31   :  { %270 = vrot.lane.b32.xlu1 %v696_v4, %s661_s21 }
  0x32   :  { %268 = vrot.lane.b32.xlu0 %v79_v9, %s661_s21 }
  0x35   :  { %276 = vrot.lane.b32.xlu1 %v694_v3, %s661_s21 }
  0x36   :  { %274 = vrot.lane.b32.xlu0 %v80_v8, %s661_s21 }
  0x39   :  { %231 = vrot.lane.b32.xlu1 %v703_v6, %s660_s1 }
  0x3a   :  { %225 = vrot.lane.b32.xlu0 %v705_v7, %s660_s1 }
  0x3d   :  { %272 = vrot.lane.b32.xlu1 %v703_v6, %s661_s21 }
  0x3e   :  { %266 = vrot.lane.b32.xlu0 %v705_v7, %s661_s21 }
  0x41   :  { %299 = vrot.lane.b32.xlu1 %v93_v18, %s662_s22 }
  0x42   :  { %297 = vrot.lane.b32.xlu0 %v705_v7, %s662_s22 }
  0x45   :  { %312 = vrot.lane.b32.xlu1 %v109_v19, %s662_s22 }
  0x46   :  { %310 = vrot.lane.b32.xlu0 %v703_v6, %s662_s22 }
  0x49   :  { %163 = vrot.lane.b32.xlu1 %v696_v4, %s663_s23 }
  0x4a   :  { %161 = vrot.lane.b32.xlu0 %v79_v9, %s663_s23 }
  0x4d   :  { %169 = vrot.lane.b32.xlu1 %v694_v3, %s663_s23 }
  0x4e   :  { %167 = vrot.lane.b32.xlu0 %v80_v8, %s663_s23 }
  0x51   :  { %308 = vrot.lane.b32.xlu1 %v108_v20, %s662_s22 }
  0x52   :  { %295 = vrot.lane.b32.xlu0 %v92_v21, %s662_s22 }
  0x55   :  { %165 = vrot.lane.b32.xlu1 %v703_v6, %s663_s23 }
  0x56   :  { %159 = vrot.lane.b32.xlu0 %v705_v7, %s663_s23 }
  0x59   :  { %204 = vrot.lane.b32.xlu1 %v696_v4, %s664_s24 }
  0x5a   :  { %202 = vrot.lane.b32.xlu0 %v79_v9, %s664_s24 }
  0x5d   :  { %217 = vrot.lane.b32.xlu1 %v694_v3, %s664_s24 }
  0x5e   :  { %215 = vrot.lane.b32.xlu0 %v80_v8, %s664_s24 }
  0x61   :  { %134 = vrot.lane.b32.xlu1 %v696_v4, %s665_s25 }
  0x62   :  { %132 = vrot.lane.b32.xlu0 %v79_v9, %s665_s25 }
  0x65   :  { %140 = vrot.lane.b32.xlu1 %v694_v3, %s665_s25 }
  0x66   :  { %138 = vrot.lane.b32.xlu0 %v80_v8, %s665_s25 }
  0x69   :  { %213 = vrot.lane.b32.xlu1 %v703_v6, %s664_s24 }
  0x6a   :  { %200 = vrot.lane.b32.xlu0 %v705_v7, %s664_s24 }
  0x6d   :  { %136 = vrot.lane.b32.xlu1 %v703_v6, %s665_s25 }
  0x6e   :  { %130 = vrot.lane.b32.xlu0 %v705_v7, %s665_s25 }
  0x71   :  { %98 = vrot.lane.b32.xlu1 %v93_v18, %s666_s26 }
  0x72   :  { %96 = vrot.lane.b32.xlu0 %v705_v7, %s666_s26 }
  0x75   :  { %114 = vrot.lane.b32.xlu1 %v109_v19, %s666_s26 }
  0x76   :  { %112 = vrot.lane.b32.xlu0 %v703_v6, %s666_s26 }
  0x79   :  { %110 = vrot.lane.b32.xlu1 %v108_v20, %s666_s26 }
  0x7a   :  { %94 = vrot.lane.b32.xlu0 %v92_v21, %s666_s26 }
  0x8f   :  { %v331_v23 = vpop.permute.xlu1 %330 }
  0x90   :  { %v325_v24 = vpop.permute.xlu0 %324 }
  0x93   :  { %v327_v27 = vpop.permute.xlu1 %326 }
  0x94   :  { %v321_v28 = vpop.permute.xlu0 %320 }
  0x97   :  { %v329_v29 = vpop.permute.xlu1 %328 }
  0x98   :  { %v323_v30 = vpop.permute.xlu0 %322  ;;  %v335_v31 = vsel %vm332_vm3, %v327_v27, %v329_v29  ;;  %v336_v32 = vsel %vm332_vm3, %v329_v29, %v331_v23 }
  0x99   :  { %v333_v33 = vsel %vm332_vm3, %v321_v28, %v323_v30  ;;  %v334_v34 = vsel %vm332_vm3, %v323_v30, %v325_v24  ;;  %v343_v35 = vsel %vm126_vm4, %v335_v31, 0.0  ;;  %v344_v36 = vsel %vm127_vm5, %v336_v32, 0.0 }
  0x9a   :  { %v341_v37 = vsel %vm126_vm4, %v333_v33, 0.0  ;;  %v342_v38 = vsel %vm127_vm5, %v334_v34, 0.0  ;;  %347 = vst [vmem:[#allocation2 + $0x90] sm:$0xf] %v343_v35  ;;  %348 = vst [vmem:[#allocation2 + $0x98] sm:$0xf] %v344_v36 }
  0x9b   :  { %345 = vst [vmem:[#allocation2 + $0x80] sm:$0xf] %v341_v37  ;;  %346 = vst [vmem:[#allocation2 + $0x88] sm:$0xf] %v342_v38  ;;  %v230_v39 = vpop.permute.xlu1 %229 }
  0x9c   :  { %v228_v40 = vpop.permute.xlu0 %227 }
  0x9d   :  { %v239_v41 = vsel %vm237_vm6, %v228_v40, %v230_v39 }
  0x9e   :  { %v247_v42 = vsel %vm127_vm5, %v239_v41, 0.0 }
  0x9f   :  { %v253_v43 = vrot.slane %v247_v42, 4  ;;  %v236_v44 = vpop.permute.xlu1 %235 }
  0xa0   :  { %v234_v45 = vpop.permute.xlu0 %233 }
  0xa1   :  { %257 = vst [vmem:[#allocation2 + $0x48] sm:$0xf0] %v253_v43  ;;  %v241_v46 = vsel %vm237_vm6, %v234_v45, %v236_v44  ;;  %v376_v49 = vld [vmem:[#allocation2 + $0x98] sm:$0x1f]  ;;  %v375_v51 = vld [vmem:[#allocation2 + $0x90] sm:$0x1f] }
  0xa2   :  { %v249_v47 = vsel %vm127_vm5, %v241_v46, 0.0  ;;  %v374_v48 = vld [vmem:[#allocation2 + $0x88] sm:$0x1f]  ;;  %562 = vmatprep.subr.msk.mxu1 %vm381_vm7, %v376_v49  ;;  %v373_v52 = vld [vmem:[#allocation2 + $0x80] sm:$0x1f] }
  0xa3   :  { %v261_v50 = vrot.slane %v249_v47, 4  ;;  %559 = vmatprep.subr.msk.mxu0 %vm381_vm7, %v374_v48  ;;  %563 = vmatpush1.msk.msra.mxu1 %vm381_vm7, %v375_v51  ;;  %v271_v53 = vpop.permute.xlu1 %270 }
  0xa4   :  { %560 = vmatpush1.msk.msra.mxu0 %vm381_vm7, %v373_v52  ;;  %v269_v54 = vpop.permute.xlu0 %268 }
  0xa5   :  { %265 = vst [vmem:[#allocation2 + $0x58] sm:$0xf0] %v261_v50  ;;  %v280_v55 = vsel %vm278_vm8, %v269_v54, %v271_v53 }
  0xa6   :  { %v288_v56 = vsel %vm72_vm1, %v280_v55, 0.0 }
  0xa7   :  { %292 = vst [vmem:[#allocation2 + $0x68] sm:$0xf] %v288_v56  ;;  %v277_v57 = vpop.permute.xlu1 %276 }
  0xa8   :  { %v275_v58 = vpop.permute.xlu0 %274 }
  0xa9   :  { %v282_v59 = vsel %vm278_vm8, %v275_v58, %v277_v57 }
  0xaa   :  { %v290_v60 = vsel %vm72_vm1, %v282_v59, 0.0 }
  0xab   :  { %294 = vst [vmem:[#allocation2 + $0x78] sm:$0xf] %v290_v60  ;;  %v232_v61 = vpop.permute.xlu1 %231 }
  0xac   :  { %v226_v62 = vpop.permute.xlu0 %225  ;;  %v240_v63 = vsel %vm237_vm6, %v232_v61, %v234_v45 }
  0xad   :  { %v238_v0 = vsel %vm237_vm6, %v226_v62, %v228_v40  ;;  %v248_v1 = vsel %vm126_vm4, %v240_v63, 0.0 }
  0xae   :  { %v246_v2 = vsel %vm126_vm4, %v238_v0, 0.0  ;;  %v260_v3 = vrot.slane %v248_v1, 4 }
  0xaf   :  { %v252_v4 = vrot.slane %v246_v2, 4  ;;  %v273_v5 = vpop.permute.xlu1 %272 }
  0xb0   :  { %v267_v6 = vpop.permute.xlu0 %266  ;;  %264 = vst [vmem:[#allocation2 + $0x50] sm:$0xf0] %v260_v3  ;;  %v281_v7 = vsel %vm278_vm8, %v273_v5, %v275_v58 }
  0xb1   :  { %256 = vst [vmem:[#allocation2 + $0x40] sm:$0xf0] %v252_v4  ;;  %v279_v8 = vsel %vm278_vm8, %v267_v6, %v269_v54  ;;  %v289_v9 = vsel %vm71_vm2, %v281_v7, 0.0 }
  0xb2   :  { %v287_v10 = vsel %vm71_vm2, %v279_v8, 0.0  ;;  %293 = vst [vmem:[#allocation2 + $0x70] sm:$0xf] %v289_v9 }
  0xb3   :  { %291 = vst [vmem:[#allocation2 + $0x60] sm:$0xf] %v287_v10  ;;  %v300_v12 = vpop.permute.xlu1 %299 }
  0xb4   :  { %v298_v13 = vpop.permute.xlu0 %297 }
  0xb5   :  { %v303_v14 = vsel %vm301_vm9, %v298_v13, %v300_v12 }
  0xb6   :  { %307 = vst [vmem:[#allocation2 + $0x68] sm:$0xf0] %v303_v14 }
  0xb7   :  { %v313_v16 = vpop.permute.xlu1 %312 }
  0xb8   :  { %v311_v17 = vpop.permute.xlu0 %310 }
  0xb9   :  { %v315_v18 = vsel %vm301_vm9, %v311_v17, %v313_v16 }
  0xba   :  { %319 = vst [vmem:[#allocation2 + $0x78] sm:$0xf0] %v315_v18 }
  0xbb   :  { %v164_v19 = vpop.permute.xlu1 %163 }
  0xbc   :  { %v162_v20 = vpop.permute.xlu0 %161 }
  0xbd   :  { %v173_v21 = vsel %vm171_vm10, %v162_v20, %v164_v19  ;;  %v370_v22 = vld [vmem:[#allocation2 + $0x68] sm:$0xff] }
  0xbe   :  { %v181_v23 = vsel %vm72_vm1, %v173_v21, 0.0  ;;  %418 = vmatprep.subr.mxu0 %v370_v22 }
  0xbf   :  { %v187_v24 = vrot.slane %v181_v23, 4  ;;  %v170_v27 = vpop.permute.xlu1 %169 }
  0xc0   :  { %v168_v28 = vpop.permute.xlu0 %167 }
  0xc1   :  { %191 = vst [vmem:[#allocation2 + $0x28] sm:$0xf0] %v187_v24  ;;  %v175_v29 = vsel %vm171_vm10, %v168_v28, %v170_v27  ;;  %v372_v30 = vld [vmem:[#allocation2 + $0x78] sm:$0xff] }
  0xc2   :  { %v183_v31 = vsel %vm72_vm1, %v175_v29, 0.0  ;;  %489 = vmatprep.subr.mxu1 %v372_v30  ;;  %v356_v27 = vld [vmem:[#allocation6] sm:$0xff] }
  0xc3   :  { %v195_v32 = vrot.slane %v183_v31, 4  ;;  %v309_v33 = vpop.permute.xlu1 %308 }
  0xc4   :  { %v296_v34 = vpop.permute.xlu0 %295  ;;  %v314_v35 = vsel %vm301_vm9, %v309_v33, %v311_v17 }
  0xc5   :  { %199 = vst [vmem:[#allocation2 + $0x38] sm:$0xf0] %v195_v32  ;;  %v302_v36 = vsel %vm301_vm9, %v296_v34, %v298_v13  ;;  %318 = vst [vmem:[#allocation2 + $0x70] sm:$0xf0] %v314_v35 }
  0xc6   :  { %306 = vst [vmem:[#allocation2 + $0x60] sm:$0xf0] %v302_v36 }
  0xc7   :  { %v166_v37 = vpop.permute.xlu1 %165 }
  0xc8   :  { %v160_v38 = vpop.permute.xlu0 %159  ;;  %v174_v39 = vsel %vm171_vm10, %v166_v37, %v168_v28 }
  0xc9   :  { %v172_v40 = vsel %vm171_vm10, %v160_v38, %v162_v20  ;;  %v182_v11 = vsel %vm71_vm2, %v174_v39, 0.0 }
  0xca   :  { %v180_v41 = vsel %vm71_vm2, %v172_v40, 0.0  ;;  %v194_v42 = vrot.slane %v182_v11, 4 }
  0xcb   :  { %v186_v43 = vrot.slane %v180_v41, 4  ;;  %v205_v44 = vpop.permute.xlu1 %204 }
  0xcc   :  { %v203_v45 = vpop.permute.xlu0 %202  ;;  %198 = vst [vmem:[#allocation2 + $0x30] sm:$0xf0] %v194_v42  ;;  %v371_v48 = vld [vmem:[#allocation2 + $0x70] sm:$0xff] }
  0xcd   :  { %190 = vst [vmem:[#allocation2 + $0x20] sm:$0xf0] %v186_v43  ;;  %v208_v46 = vsel %vm206_vm11, %v203_v45, %v205_v44  ;;  %v369_v47 = vld [vmem:[#allocation2 + $0x60] sm:$0xff]  ;;  %490 = vmatpush1.msra.mxu1 %v371_v48 }
  0xce   :  { %212 = vst [vmem:[#allocation2 + $0x48] sm:$0xf] %v208_v46  ;;  %419 = vmatpush1.msra.mxu0 %v369_v47 }
  0xcf   :  { %v218_v49 = vpop.permute.xlu1 %217 }
  0xd0   :  { %v216_v50 = vpop.permute.xlu0 %215 }
  0xd1   :  { %v220_v51 = vsel %vm206_vm11, %v216_v50, %v218_v49 }
  0xd2   :  { %224 = vst [vmem:[#allocation2 + $0x58] sm:$0xf] %v220_v51 }
  0xd3   :  { %v135_v15 = vpop.permute.xlu1 %134 }
  0xd4   :  { %v133_v52 = vpop.permute.xlu0 %132 }
  0xd5   :  { %v144_v53 = vsel %vm142_vm12, %v133_v52, %v135_v15  ;;  %v366_v54 = vld [vmem:[#allocation2 + $0x48] sm:$0xff] }
  0xd6   :  { %v152_v55 = vsel %vm127_vm5, %v144_v53, 0.0  ;;  %420 = vmatprep.subr.mxu0 %v366_v54 }
  0xd7   :  { %156 = vst [vmem:[#allocation2 + $0x28] sm:$0xf] %v152_v55  ;;  %v141_v56 = vpop.permute.xlu1 %140 }
  0xd8   :  { %v139_v57 = vpop.permute.xlu0 %138 }
  0xd9   :  { %v146_v58 = vsel %vm142_vm12, %v139_v57, %v141_v56  ;;  %v368_v59 = vld [vmem:[#allocation2 + $0x58] sm:$0xff] }
  0xda   :  { %v154_v60 = vsel %vm127_vm5, %v146_v58, 0.0  ;;  %491 = vmatprep.subr.mxu1 %v368_v59 }
  0xdb   :  { %158 = vst [vmem:[#allocation2 + $0x38] sm:$0xf] %v154_v60  ;;  %v214_v61 = vpop.permute.xlu1 %213 }
  0xdc   :  { %v201_v62 = vpop.permute.xlu0 %200  ;;  %v219_v63 = vsel %vm206_vm11, %v214_v61, %v216_v50 }
  0xdd   :  { %v207_v0 = vsel %vm206_vm11, %v201_v62, %v203_v45  ;;  %223 = vst [vmem:[#allocation2 + $0x50] sm:$0xf] %v219_v63 }
  0xde   :  { %211 = vst [vmem:[#allocation2 + $0x40] sm:$0xf] %v207_v0  ;;  %v362_v12 = vld [vmem:[#allocation2 + $0x28] sm:$0xff] }
  0xdf   :  { %v137_v1 = vpop.permute.xlu1 %136 }
  0xe0   :  { %v131_v2 = vpop.permute.xlu0 %130  ;;  %v145_v3 = vsel %vm142_vm12, %v137_v1, %v139_v57 }
  0xe1   :  { %v143_v4 = vsel %vm142_vm12, %v131_v2, %v133_v52  ;;  %v153_v26 = vsel %vm126_vm4, %v145_v3, 0.0 }
  0xe2   :  { %v151_v5 = vsel %vm126_vm4, %v143_v4, 0.0  ;;  %157 = vst [vmem:[#allocation2 + $0x30] sm:$0xf] %v153_v26  ;;  %v364_v13 = vld [vmem:[#allocation2 + $0x38] sm:$0xff] }
  0xe3   :  { %155 = vst [vmem:[#allocation2 + $0x20] sm:$0xf] %v151_v5  ;;  %v99_v6 = vpop.permute.xlu1 %98 }
  0xe4   :  { %v97_v7 = vpop.permute.xlu0 %96  ;;  %v367_v10 = vld [vmem:[#allocation2 + $0x50] sm:$0xff] }
  0xe5   :  { %v102_v8 = vsel %vm100_vm13, %v97_v7, %v99_v6  ;;  %v365_v9 = vld [vmem:[#allocation2 + $0x40] sm:$0xff]  ;;  %492 = vmatpush1.msra.mxu1 %v367_v10 }
  0xe6   :  { %106 = vst [vmem:[#allocation2 + $0x8] sm:$0xf0] %v102_v8  ;;  %421 = vmatpush1.msra.mxu0 %v365_v9  ;;  %493 = vmatprep.subr.mxu1 %v364_v13 }
  0xe7   :  { %422 = vmatprep.subr.mxu0 %v362_v12  ;;  %v115_v14 = vpop.permute.xlu1 %114 }
  0xe8   :  { %v113_v16 = vpop.permute.xlu0 %112 }
  0xe9   :  { %v117_v25 = vsel %vm100_vm13, %v113_v16, %v115_v14  ;;  %v363_v18 = vld [vmem:[#allocation2 + $0x30] sm:$0xff] }
  0xea   :  { %121 = vst [vmem:[#allocation2 + $0x18] sm:$0xf0] %v117_v25  ;;  %v361_v17 = vld [vmem:[#allocation2 + $0x20] sm:$0xff]  ;;  %494 = vmatpush1.msra.mxu1 %v363_v18 }
  0xeb   :  { %423 = vmatpush1.msra.mxu0 %v361_v17  ;;  %v111_v19 = vpop.permute.xlu1 %110 }
  0xec   :  { %v95_v20 = vpop.permute.xlu0 %94  ;;  %v116_v21 = vsel %vm100_vm13, %v111_v19, %v113_v16 }
  0xed   :  { %v101_v22 = vsel %vm100_vm13, %v95_v20, %v97_v7  ;;  %v358_v23 = vld [vmem:[#allocation2 + $0x8] sm:$0xff]  ;;  %120 = vst [vmem:[#allocation2 + $0x10] sm:$0xf0] %v116_v21 }
  0xee   :  { %105 = vst [vmem:[#allocation2] sm:$0xf0] %v101_v22  ;;  %424 = vmatprep.subr.mxu0 %v358_v23 }
  0xf1   :  { %v360_v24 = vld [vmem:[#allocation2 + $0x18] sm:$0xff] }
  0xf2   :  { %495 = vmatprep.subr.mxu1 %v360_v24 }
  0xf4   :  { %v359_v29 = vld [vmem:[#allocation2 + $0x10] sm:$0xff] }
  0xf5   :  { %v357_v28 = vld [vmem:[#allocation2] sm:$0xff]  ;;  %496 = vmatpush1.msra.mxu1 %v359_v29 }
  0xf6   :  { %425 = vmatpush1.msra.mxu0 %v357_v28  ;;  %564 = vmatmul.mubr.msk.f32.vlgmr.msra.gmra.mxu1 %vm377_vm14, %v356_v27 }
  0xf7   :  { %561 = vmatmul.mubr.msk.f32.vlgmr.msra.gmra.mxu0 %vm377_vm14, %v356_v27 }
 0x1b6   :  { %v531_v31 = vpop.f32.mrf.mxu1 }
 0x1b7   :  { %v460_v30 = vpop.f32.mrf.mxu0  ;;  %539 = vst [vmem:[#allocation8 + $0x10] sm:$0xff] %v531_v31 }
 0x1b8   :  { %536 = vst [vmem:[#allocation8] sm:$0xff] %v460_v30  ;;  %v533_v33 = vpop.f32.mrf.mxu1 }
 0x1b9   :  { %v462_v32 = vpop.f32.mrf.mxu0  ;;  %540 = vst [vmem:[#allocation8 + $0x18] sm:$0xff] %v533_v33 }
 0x1ba   :  { %537 = vst [vmem:[#allocation8 + $0x8] sm:$0xff] %v462_v32 }
 0x1bb   :  { %639 = shalt.err (!%p636_p0)
}
 0x1bc   :  { %s669_s30 = smov 256   ;;  %s670_s3 = smov 16  }
 0x1bd   :  { %552 = dma.vmem_to_hbm [thread:$0]  %s547_s28, 512, %s846_s2, [#allocation5], %s669_s30, %s669_s30, %s670_s3  }
 0x1be   :  { %652 = dma.done.wait [#allocation5], 512  }
 0x1bf   :  { %653 = vsyncadd [#allocation5], 4294966784 }
 0x1c0   :  { %556 = vsyncpa [#allocation4], 1 }
 0x1c1   :  { %557 = vsyncpa [#allocation7], 1 }
 0x1c2   :  { %558 = vsyncpa [#allocation5], 1 }

</bundles_post_ra>
